<compile_context>
chip_gen: v7x
topology: tpu7x:2x2x1
jax: 0.10.0
libtpu: 0.0.40
codegen_flags: <defaults>
</compile_context>

<pallas_src>
import functools

import jax
import jax.numpy as jnp
from jax.experimental import pallas as pl
from jax.experimental.pallas import tpu as pltpu


def _disc_kernel(x_ref, y_ref, w1x_ref, w1y_ref, b1_ref, w2_ref, b2_ref,
                 o_ref, h_acc):
    """One (discriminator, K-tile) grid step.

    x_ref  : [R, tk]   bf16   R = 2*B stacked rows for this discriminator
    y_ref  : [R, tk]   bf16
    w1x_ref: [tk, H]   bf16   K-tile of the x-half of W1
    w1y_ref: [tk, H]   bf16   K-tile of the y-half of W1
    b1_ref : [1, H]    f32
    w2_ref : [1, H]    f32    output projection (applied as a VPU reduction)
    b2_ref : [1, 1]    f32
    o_ref  : [R, 1]    f32    per-row logit
    h_acc  : [R, H]    f32    VMEM accumulator across K tiles
    """
    k = pl.program_id(1)

    @pl.when(k == 0)
    def _init():
        h_acc[...] = jnp.zeros_like(h_acc)

    # MXU: bf16 x bf16 -> f32 accumulate.
    h_acc[...] += (
        jnp.dot(x_ref[...], w1x_ref[...], preferred_element_type=jnp.float32)
        + jnp.dot(y_ref[...], w1y_ref[...], preferred_element_type=jnp.float32)
    )

    @pl.when(k == pl.num_programs(1) - 1)
    def _finalize():
        h = h_acc[...] + b1_ref[...]
        h = jnp.where(h > 0.0, h, 0.2 * h)                    # LeakyReLU(0.2)
        # Output projection on the VPU/XLU (avoids a degenerate N=1 MXU pass).
        logit = jnp.sum(h * w2_ref[...], axis=-1, keepdims=True) + b2_ref[...]
        o_ref[...] = logit.astype(o_ref.dtype)


def _pick_k_tile(feat_half, max_tile=2048):
    """Largest K tile that is a multiple of 128, divides FEAT, and <= max_tile."""
    if feat_half <= max_tile or feat_half % 128 != 0:
        return feat_half
    tk = (max_tile // 128) * 128
    while tk >= 128:
        if feat_half % tk == 0:
            return tk
        tk -= 128
    return feat_half


def _fused_disc_call(x_stack, y_stack, w1x, w1y, b1, w2, b2, k_tile):
    n_disc, rows, feat_half = x_stack.shape
    hidden = w1x.shape[-1]
    k_steps = feat_half // k_tile

    return pl.pallas_call(
        _disc_kernel,
        out_shape=jax.ShapeDtypeStruct((n_disc, rows, 1), jnp.float32),
        grid=(n_disc, k_steps),
        in_specs=[
            pl.BlockSpec((None, rows, k_tile), lambda d, k: (d, 0, k)),    # x
            pl.BlockSpec((None, rows, k_tile), lambda d, k: (d, 0, k)),    # y
            pl.BlockSpec((None, k_tile, hidden), lambda d, k: (d, k, 0)),  # W1x
            pl.BlockSpec((None, k_tile, hidden), lambda d, k: (d, k, 0)),  # W1y
            pl.BlockSpec((None, 1, hidden), lambda d, k: (d, 0, 0)),       # b1
            pl.BlockSpec((None, 1, hidden), lambda d, k: (d, 0, 0)),       # w2
            pl.BlockSpec((None, 1, 1), lambda d, k: (d, 0, 0)),            # b2
        ],
        out_specs=pl.BlockSpec((None, rows, 1), lambda d, k: (d, 0, 0)),
        scratch_shapes=[pltpu.VMEM((rows, hidden), jnp.float32)],
        compiler_params=pltpu.CompilerParams(
            dimension_semantics=("parallel", "arbitrary")),
    )(x_stack, y_stack, w1x, w1y, b1, w2, b2)


@functools.partial(jax.jit, static_argnames=("k_tile",))
def _forward(x_diff, y_diff, x_pos, y_pos, x_neg, y_neg,
             w1x, w1y, b1, w2, b2, k_tile):
    B = x_diff.shape[0]

    def flat(a):
        return a.reshape(B, -1).astype(jnp.bfloat16)

    # Disc slot 0 = D1 (x_diff/y_diff rows duplicated to 2B rows so the block
    # shape is uniform); slot 1 = D2 with pos/neg stacked so D2's weights are
    # fetched exactly once.
    x_stack = jnp.stack([
        jnp.concatenate([flat(x_diff), flat(x_diff)], axis=0),
        jnp.concatenate([flat(x_pos), flat(x_neg)], axis=0),
    ])
    y_stack = jnp.stack([
        jnp.concatenate([flat(y_diff), flat(y_diff)], axis=0),
        jnp.concatenate([flat(y_pos), flat(y_neg)], axis=0),
    ])

    out = _fused_disc_call(x_stack, y_stack, w1x, w1y, b1, w2, b2, k_tile)
    pred_diff = out[0, :B]
    pred_pos = out[1, :B]
    pred_neg = out[1, B:]
    return pred_diff, pred_pos, pred_neg


def _make_disc_params(key, feat_half, hidden):
    """Deterministic synthetic parameters for one conditional discriminator."""
    k1, k2, k3, k4 = jax.random.split(key, 4)
    scale1 = 1.0 / (2.0 * feat_half) ** 0.5
    w1x = (jax.random.normal(k1, (feat_half, hidden), jnp.float32)
           * scale1).astype(jnp.bfloat16)
    w1y = (jax.random.normal(k2, (feat_half, hidden), jnp.float32)
           * scale1).astype(jnp.bfloat16)
    b1 = jax.random.normal(k3, (1, hidden), jnp.float32) * 0.01
    w2 = jax.random.normal(k4, (1, hidden), jnp.float32) * (1.0 / hidden ** 0.5)
    b2 = jnp.zeros((1, 1), jnp.float32)
    return (w1x, w1y, b1, w2, b2)


class DiscriminatorWrapper:
    """JAX/Pallas equivalent of Discriminator_warpper.forward (fused launch)."""

    def __init__(self, params_d1, params_d2, k_tile=None):
        # Stack the two discriminators' parameters along a leading axis so one
        # grid axis selects between them inside a single kernel launch.
        self.w1x = jnp.stack([params_d1[0], params_d2[0]])  # [2, Fh, H] bf16
        self.w1y = jnp.stack([params_d1[1], params_d2[1]])  # [2, Fh, H] bf16
        self.b1 = jnp.stack([params_d1[2], params_d2[2]])   # [2, 1, H]  f32
        self.w2 = jnp.stack([params_d1[3], params_d2[3]])   # [2, 1, H]  f32
        self.b2 = jnp.stack([params_d1[4], params_d2[4]])   # [2, 1, 1]  f32
        feat_half = self.w1x.shape[1]
        self.k_tile = int(k_tile) if k_tile is not None else _pick_k_tile(feat_half)

    def __call__(self, x_diff, y_diff, x_pos, y_pos, x_neg, y_neg):
        return _forward(x_diff, y_diff, x_pos, y_pos, x_neg, y_neg,
                        self.w1x, self.w1y, self.b1, self.w2, self.b2,
                        self.k_tile)


if __name__ == "__main__":
    # Small shapes: batch=2, channels=4, spatial=16x16 (NCHW).
    B, C, H, W = 2, 4, 16, 16
    HIDDEN = 128
    FEAT_HALF = C * H * W  # per-tensor flattened feature count (x or y)

    root = jax.random.PRNGKey(0)
    keys = jax.random.split(root, 8)

    params_d1 = _make_disc_params(keys[0], FEAT_HALF, HIDDEN)
    params_d2 = _make_disc_params(keys[1], FEAT_HALF, HIDDEN)

    x_diff = jax.random.normal(keys[2], (B, C, H, W), jnp.float32)
    y_diff = jax.random.normal(keys[3], (B, C, H, W), jnp.float32)
    x_pos = jax.random.normal(keys[4], (B, C, H, W), jnp.float32)
    y_pos = jax.random.normal(keys[5], (B, C, H, W), jnp.float32)
    x_neg = jax.random.normal(keys[6], (B, C, H, W), jnp.float32)
    y_neg = jax.random.normal(keys[7], (B, C, H, W), jnp.float32)

    # k_tile=512 -> two K steps, exercising the accumulate/finalize pipeline.
    wrapper = DiscriminatorWrapper(params_d1, params_d2, k_tile=512)
    pred_diff, pred_pos, pred_neg = wrapper(
        x_diff, y_diff, x_pos, y_pos, x_neg, y_neg)
    jax.block_until_ready((pred_diff, pred_pos, pred_neg))

    # Pure-JAX reference of the same synthetic discriminator (same bf16
    # rounding of activations/W1, f32 accumulation).
    def ref_disc(x, y, params):
        w1x, w1y, b1, w2, b2 = params
        xf = x.reshape(B, -1).astype(jnp.bfloat16).astype(jnp.float32)
        yf = y.reshape(B, -1).astype(jnp.bfloat16).astype(jnp.float32)
        h = xf @ w1x.astype(jnp.float32) + yf @ w1y.astype(jnp.float32) + b1
        h = jnp.where(h > 0, h, 0.2 * h)
        return jnp.sum(h * w2, axis=-1, keepdims=True) + b2

    assert pred_diff.shape == (B, 1)
    assert pred_pos.shape == (B, 1)
    assert pred_neg.shape == (B, 1)
    assert jnp.allclose(pred_diff, ref_disc(x_diff, y_diff, params_d1),
                        atol=2e-3, rtol=2e-3)
    assert jnp.allclose(pred_pos, ref_disc(x_pos, y_pos, params_d2),
                        atol=2e-3, rtol=2e-3)
    assert jnp.allclose(pred_neg, ref_disc(x_neg, y_neg, params_d2),
                        atol=2e-3, rtol=2e-3)

    print("KERNEL_OK")
</pallas_src>

<mosaic_0001>
module attributes {stable_mosaic.version = 11 : i64} {
  func.func @_disc_kernel(%arg0: i32, %arg1: i32, %arg2: memref<1x4x512xbf16, #tpu.memory_space<vmem>>, %arg3: memref<1x4x512xbf16, #tpu.memory_space<vmem>>, %arg4: memref<1x512x128xbf16, #tpu.memory_space<vmem>>, %arg5: memref<1x512x128xbf16, #tpu.memory_space<vmem>>, %arg6: memref<1x1x128xf32, #tpu.memory_space<vmem>>, %arg7: memref<1x1x128xf32, #tpu.memory_space<vmem>>, %arg8: memref<1x1x1xf32, #tpu.memory_space<vmem>>, %arg9: memref<1x4x1xf32, #tpu.memory_space<vmem>>, %arg10: memref<4x128xf32, #tpu.memory_space<vmem>>) attributes {dimension_semantics = [#tpu.dimension_semantics<parallel>, #tpu.dimension_semantics<arbitrary>], iteration_bounds = array<i64: 2, 2>, scalar_prefetch = 0 : i64, scratch_operands = 1 : i64, tpu.core_type = #tpu.core_type<tc>, window_params = [{transform_indices = @transform_0, window_bounds = array<i64: 1, 4, 512>}, {transform_indices = @transform_1, window_bounds = array<i64: 1, 4, 512>}, {transform_indices = @transform_2, window_bounds = array<i64: 1, 512, 128>}, {transform_indices = @transform_3, window_bounds = array<i64: 1, 512, 128>}, {transform_indices = @transform_4, window_bounds = array<i64: 1, 1, 128>}, {transform_indices = @transform_5, window_bounds = array<i64: 1, 1, 128>}, {transform_indices = @transform_6, window_bounds = array<i64: 1, 1, 1>}, {transform_indices = @transform_7, window_bounds = array<i64: 1, 4, 1>}]} {
    %c0_i32 = arith.constant 0 : i32
    %0 = arith.cmpi eq, %arg1, %c0_i32 : i32
    %1 = arith.extui %0 : i1 to i32
    %c0_i32_0 = arith.constant 0 : i32
    %2 = arith.cmpi ne, %1, %c0_i32_0 : i32
    scf.if %2 {
      %cst_18 = arith.constant 0.000000e+00 : f32
      %20 = vector.broadcast %cst_18 : f32 to vector<4x128xf32>
      %c0_19 = arith.constant 0 : index
      %c0_20 = arith.constant 0 : index
      %21 = vector.load %arg10[%c0_19, %c0_20] : memref<4x128xf32, #tpu.memory_space<vmem>>, vector<4x128xf32>
      tpu.vector_store %arg10[%c0_19, %c0_20], %20 {strides = array<i32>} : memref<4x128xf32, #tpu.memory_space<vmem>>, vector<4x128xf32>,
    } else {
    }
    %c0 = arith.constant 0 : index
    %c0_1 = arith.constant 0 : index
    %3 = vector.load %arg10[%c0, %c0_1] : memref<4x128xf32, #tpu.memory_space<vmem>>, vector<4x128xf32>
    %c0_2 = arith.constant 0 : index
    %c0_3 = arith.constant 0 : index
    %c0_4 = arith.constant 0 : index
    %4 = vector.load %arg2[%c0_2, %c0_3, %c0_4] : memref<1x4x512xbf16, #tpu.memory_space<vmem>>, vector<1x4x512xbf16>
    %5 = vector.shape_cast %4 : vector<1x4x512xbf16> to vector<4x512xbf16>
    %c0_5 = arith.constant 0 : index
    %c0_6 = arith.constant 0 : index
    %c0_7 = arith.constant 0 : index
    %6 = vector.load %arg4[%c0_5, %c0_6, %c0_7] : memref<1x512x128xbf16, #tpu.memory_space<vmem>>, vector<1x512x128xbf16>
    %7 = vector.shape_cast %6 : vector<1x512x128xbf16> to vector<512x128xbf16>
    %cst = arith.constant dense<0.000000e+00> : vector<4x128xf32>
    %8 = tpu.matmul %5, %7, %cst {dimension_numbers = #tpu.dot_dimension_numbers<[1], [0], [0], [1], [0, 0, 1, 1], [], []>} : vector<4x512xbf16>, vector<512x128xbf16>, vector<4x128xf32> -> vector<4x128xf32>
    %c0_8 = arith.constant 0 : index
    %c0_9 = arith.constant 0 : index
    %c0_10 = arith.constant 0 : index
    %9 = vector.load %arg3[%c0_8, %c0_9, %c0_10] : memref<1x4x512xbf16, #tpu.memory_space<vmem>>, vector<1x4x512xbf16>
    %10 = vector.shape_cast %9 : vector<1x4x512xbf16> to vector<4x512xbf16>
    %c0_11 = arith.constant 0 : index
    %c0_12 = arith.constant 0 : index
    %c0_13 = arith.constant 0 : index
    %11 = vector.load %arg5[%c0_11, %c0_12, %c0_13] : memref<1x512x128xbf16, #tpu.memory_space<vmem>>, vector<1x512x128xbf16>
    %12 = vector.shape_cast %11 : vector<1x512x128xbf16> to vector<512x128xbf16>
    %cst_14 = arith.constant dense<0.000000e+00> : vector<4x128xf32>
    %13 = tpu.matmul %10, %12, %cst_14 {dimension_numbers = #tpu.dot_dimension_numbers<[1], [0], [0], [1], [0, 0, 1, 1], [], []>} : vector<4x512xbf16>, vector<512x128xbf16>, vector<4x128xf32> -> vector<4x128xf32>
    %14 = arith.addf %8, %13 : vector<4x128xf32>
    %15 = arith.addf %3, %14 : vector<4x128xf32>
    %c0_15 = arith.constant 0 : index
    %c0_16 = arith.constant 0 : index
    %16 = vector.load %arg10[%c0_15, %c0_16] : memref<4x128xf32, #tpu.memory_space<vmem>>, vector<4x128xf32>
    tpu.vector_store %arg10[%c0_15, %c0_16], %15 {strides = array<i32>} : memref<4x128xf32, #tpu.memory_space<vmem>>, vector<4x128xf32>,
    %c1_i32 = arith.constant 1 : i32
    %17 = arith.cmpi eq, %arg1, %c1_i32 : i32
    %18 = arith.extui %17 : i1 to i32
    %c0_i32_17 = arith.constant 0 : i32
    %19 = arith.cmpi ne, %18, %c0_i32_17 : i32
    scf.if %19 {
      %c0_18 = arith.constant 0 : index
      %c0_19 = arith.constant 0 : index
      %20 = vector.load %arg10[%c0_18, %c0_19] : memref<4x128xf32, #tpu.memory_space<vmem>>, vector<4x128xf32>
      %c0_20 = arith.constant 0 : index
      %c0_21 = arith.constant 0 : index
      %c0_22 = arith.constant 0 : index
      %21 = vector.load %arg6[%c0_20, %c0_21, %c0_22] : memref<1x1x128xf32, #tpu.memory_space<vmem>>, vector<1x1x128xf32>
      %22 = vector.shape_cast %21 : vector<1x1x128xf32> to vector<1x128xf32>
      %23 = vector.broadcast %22 : vector<1x128xf32> to vector<4x128xf32>
      %24 = arith.addf %20, %23 : vector<4x128xf32>
      %cst_23 = arith.constant 0.000000e+00 : f32
      %25 = vector.broadcast %cst_23 : f32 to vector<4x128xf32>
      %26 = arith.cmpf ogt, %24, %25 : vector<4x128xf32>
      %cst_24 = arith.constant 2.000000e-01 : f32
      %27 = vector.broadcast %cst_24 : f32 to vector<4x128xf32>
      %28 = arith.mulf %27, %24 : vector<4x128xf32>
      %29 = arith.select %26, %24, %28 : vector<4x128xi1>, vector<4x128xf32>
      %c0_25 = arith.constant 0 : index
      %c0_26 = arith.constant 0 : index
      %c0_27 = arith.constant 0 : index
      %30 = vector.load %arg7[%c0_25, %c0_26, %c0_27] : memref<1x1x128xf32, #tpu.memory_space<vmem>>, vector<1x1x128xf32>
      %31 = vector.shape_cast %30 : vector<1x1x128xf32> to vector<1x128xf32>
      %32 = vector.broadcast %31 : vector<1x128xf32> to vector<4x128xf32>
      %33 = arith.mulf %29, %32 : vector<4x128xf32>
      %cst_28 = arith.constant dense<0.000000e+00> : vector<4xf32>
      %34 = vector.multi_reduction <add>, %33, %cst_28 [1] : vector<4x128xf32> to vector<4xf32>
      %35 = vector.shape_cast %34 : vector<4xf32> to vector<4x1xf32>
      %c0_29 = arith.constant 0 : index
      %c0_30 = arith.constant 0 : index
      %c0_31 = arith.constant 0 : index
      %36 = vector.load %arg8[%c0_29, %c0_30, %c0_31] : memref<1x1x1xf32, #tpu.memory_space<vmem>>, vector<1x1x1xf32>
      %37 = vector.shape_cast %36 : vector<1x1x1xf32> to vector<1x1xf32>
      %38 = vector.broadcast %37 : vector<1x1xf32> to vector<4x1xf32>
      %39 = arith.addf %35, %38 : vector<4x1xf32>
      %c0_32 = arith.constant 0 : index
      %c0_33 = arith.constant 0 : index
      %c0_34 = arith.constant 0 : index
      %40 = vector.load %arg9[%c0_32, %c0_33, %c0_34] : memref<1x4x1xf32, #tpu.memory_space<vmem>>, vector<1x4x1xf32>
      %41 = vector.shape_cast %40 : vector<1x4x1xf32> to vector<4x1xf32>
      %42 = vector.shape_cast %39 : vector<4x1xf32> to vector<1x4x1xf32>
      tpu.vector_store %arg9[%c0_32, %c0_33, %c0_34], %42 {strides = array<i32>} : memref<1x4x1xf32, #tpu.memory_space<vmem>>, vector<1x4x1xf32>,
    } else {
    }
    return
  }
  func.func @transform_0(%arg0: i32, %arg1: i32) -> (i32, i32, i32) {
    %c0_i32 = arith.constant 0 : i32
    %c0_i32_0 = arith.constant 0 : i32
    return %arg0, %c0_i32, %arg1 : i32, i32, i32
  }
  func.func @transform_1(%arg0: i32, %arg1: i32) -> (i32, i32, i32) {
    %c0_i32 = arith.constant 0 : i32
    %c0_i32_0 = arith.constant 0 : i32
    return %arg0, %c0_i32, %arg1 : i32, i32, i32
  }
  func.func @transform_2(%arg0: i32, %arg1: i32) -> (i32, i32, i32) {
    %c0_i32 = arith.constant 0 : i32
    %c0_i32_0 = arith.constant 0 : i32
    return %arg0, %arg1, %c0_i32 : i32, i32, i32
  }
  func.func @transform_3(%arg0: i32, %arg1: i32) -> (i32, i32, i32) {
    %c0_i32 = arith.constant 0 : i32
    %c0_i32_0 = arith.constant 0 : i32
    return %arg0, %arg1, %c0_i32 : i32, i32, i32
  }
  func.func @transform_4(%arg0: i32, %arg1: i32) -> (i32, i32, i32) {
    %c0_i32 = arith.constant 0 : i32
    %c0_i32_0 = arith.constant 0 : i32
    %c0_i32_1 = arith.constant 0 : i32
    return %arg0, %c0_i32, %c0_i32_0 : i32, i32, i32
  }
  func.func @transform_5(%arg0: i32, %arg1: i32) -> (i32, i32, i32) {
    %c0_i32 = arith.constant 0 : i32
    %c0_i32_0 = arith.constant 0 : i32
    %c0_i32_1 = arith.constant 0 : i32
    return %arg0, %c0_i32, %c0_i32_0 : i32, i32, i32
  }
  func.func @transform_6(%arg0: i32, %arg1: i32) -> (i32, i32, i32) {
    %c0_i32 = arith.constant 0 : i32
    %c0_i32_0 = arith.constant 0 : i32
    %c0_i32_1 = arith.constant 0 : i32
    return %arg0, %c0_i32, %c0_i32_0 : i32, i32, i32
  }
  func.func @transform_7(%arg0: i32, %arg1: i32) -> (i32, i32, i32) {
    %c0_i32 = arith.constant 0 : i32
    %c0_i32_0 = arith.constant 0 : i32
    %c0_i32_1 = arith.constant 0 : i32
    return %arg0, %c0_i32, %c0_i32_0 : i32, i32, i32
  }
}

</mosaic_0001>

<bundles_post_ra>
// kernel: _forward.1
= control target key start
LH: loop header
LB: loop body
LE: loop exit
PB: predicated region body
PF: predicated region fallthrough
CT: control target
= control target key end

     0   :  { %s2131_s0 = inlined_call_operand.vmem [shape: bf16[2,4,1024], index: 0, kind: input, shape index: {}]   ;;  %s2132_s1 = inlined_call_operand.vmem [shape: bf16[2,4,1024], index: 1, kind: input, shape index: {}]   ;;  %s2133_s2 = inlined_call_operand.vmem [shape: bf16[2,1024,128], index: 2, kind: input, shape index: {}]   ;;  %s2134_s3 = inlined_call_operand.hbm [shape: bf16[2,1024,128], index: 3, kind: input, shape index: {}]   ;;  %s2135_s4 = inlined_call_operand.vmem [shape: f32[2,1,128], index: 4, kind: input, shape index: {}]   ;;  %s2136_s5 = inlined_call_operand.vmem [shape: f32[2,1,128], index: 5, kind: input, shape index: {}]   ;;  %s2137_s6 = inlined_call_operand.vmem [shape: f32[2,1,1], index: 6, kind: input, shape index: {}]   ;;  %s2138_s7 = inlined_call_operand.vmem [shape: f32[2,4,1], index: 7, kind: output, shape index: {}]  }
   0x1   :  { %2143 = sst [smem:[#allocation10_spill]] %s2131_s0 }
   0x2   :  { %2144 = sst [smem:[#allocation11_spill]] %s2132_s1 }
   0x3   :  { %2145 = sst [smem:[#allocation12_spill]] %s2133_s2 }
   0x4   :  { %2146 = sst [smem:[#allocation13_spill]] %s2134_s3 }
   0x5   :  { %2147 = sst [smem:[#allocation14_spill]] %s2138_s7 }
   0x6   :  { %12 = vsyncpa [#allocation4], 0 }
   0x7   :  { %14 = vsyncpa [#allocation4 + $0x1], 0  ;;  %s1852_s24 = smov 0   ;;  %s1854_s25 = smov 0  }
   0x8   :  { %s1856_s26 = smov 0   ;;  %s1858_s27 = smov 0  }
   0x9   :  { %s1860_s28 = smov 0   ;;  %s1862_s29 = smov 0  }
   0xa   :  { %s1864_s30 = smov 0   ;;  %s1866_s8 = smov 0  }
   0xb LB: > { %2148 = sst [smem:[#allocation6_spill]] %s1797_s29  ;;  %s1389_s9 = sadd.s32 4294967295, %s1805_s8   ;;  %s1805_s8 = sphi %s1866_s8, %s20_s8   ;;  %s1801_s30 = sphi %s1864_s30, %s2165_s30   ;;  %s1797_s29 = sphi %s1862_s29, %s2164_s29   ;;  %s1793_s28 = sphi %s1860_s28, %s2163_s28   ;;  %s1789_s27 = sphi %s1858_s27, %s2162_s27   ;;  %s1785_s26 = sphi %s1856_s26, %s2168_s26   ;;  %s1781_s25 = sphi %s1854_s25, %s2167_s25   ;;  %s1777_s24 = sphi %s1852_s24, %s2166_s24  }
   0xc   : > { %2149 = sst [smem:[#allocation7_spill]] %s1801_s30  ;;  %s29_s10 = sadd.s32 1, %s1797_s29 }
   0xd   : > { %p30_p0 = scmp.ge.s32.totalorder %s29_s10, 2  ;;  %s32_s11 = sadd.s32 1, %s1801_s30 }
   0xe   : > { %s125_s12 = sadd.s32 1, %s1785_s26  ;;  %p132_p1 = scmp.ne.s32.totalorder %s1785_s26, %s1781_s25 }
   0xf   : > { %s2170_s10 = smov (%p30_p0, %s29_s10), 0  ;;  %s2172_s11 = smov (!%p30_p0, %s32_s11), %s1801_s30 }
  0x10   : > { %2150 = sst [smem:[#allocation8_spill]] %s2170_s10  ;;  %s121_s13 = ssub.s32 %s1797_s29, %s2170_s10 }
  0x11   : > { %p133_p2 = scmp.eq.s32.totalorder %s1805_s8, 0  ;;  %p34_p3 = scmp.ge.s32.totalorder %s2172_s11, 2 }
  0x12   : > { %p138_p4 = scmp.ne.s32.totalorder %s1781_s25, %s1777_s24  ;;  %p139_p6 = scmp.eq.s32.totalorder %s1389_s9, 0 }
  0x13   : > { %p1903_p5 = por %p133_p2, %p132_p1  ;;  %s2174_s11 = smov (%p34_p3, %s2172_s11), 0 }
  0x14   : > { %2152 = sst [smem:[#allocation9_spill]] %s2174_s11  ;;  %p1909_p7 = por %p139_p6, %p138_p4 }
  0x15   : > { %s120_s16 = ssub.s32 %s1801_s30, %s2174_s11  ;;  %p1574_p8 = scmp.lt.s32.totalorder %s1805_s8, 4 }
  0x16   : > { %s122_s17 = sor.u32 %s121_s13, %s120_s16  ;;  %s305_s18 = sand.u32 1, %s1785_s26  }
  0x17   : > { %p123_p9 = scmp.eq.s32.totalorder %s122_s17, 0  ;;  %s1393_s19 = sshll.u32 %s305_s18, 8 }
  0x18   : > { %s1394_s20 = sshll.u32 %s1797_s29, 6  ;;  %s1395_s22 = sshll.u32 %s1801_s30, 7 }
  0x19   : > { %s1919_s21 = scalar_select %p123_p9, %s1785_s26, %s125_s12  }
  0x1a   : > { %s315_s23 = sadd.s32 %s1395_s22, %s1394_s20  ;;  %s309_s24 = scalar_lea.vmem [#allocation3], %s1393_s19 }
  0x1b   : > { %s318_s9 = sshll.u32 %s309_s24, 4  ;;  %s1396_s10 = sshll.u32 %s315_s23, 6  ;;  %s1922_s9 = int_to_ptr.vmem [resolvable:$true] %s318_s9 }
  0x1c   : > { %s2154_s3 = sld [smem:[#allocation13_spill]]  ;;  %p1933_p10 = pnand %p1574_p8, %p1903_p5 }
  0x1d   : > { %s1938_s13 = scalar_lea.sflag [#allocation4], %s305_s18 }
  0x1e   : > { %p1711_p13 = pneg %p1933_p10 }
  0x22   : > { %s1927_s11 = scalar_lea.hbm %s2154_s3, %s1396_s10  ;;  %s1714_s10 = scalar_lea.hbm %s2154_s3, 16384 }
  0x23   : > { %s1709_s16 = scalar_lea.hbm %s1927_s11, 4096  ;;  %p1715_p2 = scmp.lt.u32.totalorder %s1927_s11, %s2154_s3 }
  0x24   : > { %p1710_p12 = scmp.ne.s32.totalorder %s1927_s11, %s1709_s16  ;;  %p1716_p3 = scmp.lt.u32.totalorder %s1714_s10, %s1709_s16 }
  0x25   : > { %p1718_p5 = scmp.lt.u32.totalorder %s1709_s16, %s1927_s11 }
  0x26   : > { %p1712_p0 = pnand %p1711_p13, %p1710_p12  ;;  %p1717_p4 = por %p1716_p3, %p1715_p2 }
  0x28   : > { %p1713_p1 = pneg %p1712_p0  ;;  %p1719_p6 = por %p1718_p5, %p1717_p4 }
  0x2a   : > { %p1720_p8 = pnand %p1719_p6, %p1713_p1 }
  0x2c   : > { %1723 = shalt.err (!%p1720_p8)
}
  0x2d   : > { %s1724_s18 = scalar_lea.vmem %s1922_s9, 4096  ;;  %s1807_s19 = smov [#allocation3]  }
  0x2e   : > { %p1725_p9 = scmp.ne.s32.totalorder %s1922_s9, %s1724_s18  ;;  %s1729_s20 = sshll.u32 %s1807_s19, 4  ;;  %s1730_s20 = int_to_ptr.vmem [resolvable:$false] %s1729_s20 }
  0x2f   : > { %s1731_s22 = scalar_lea.vmem %s1730_s20, 8192  ;;  %p1732_p11 = scmp.lt.s32.totalorder %s1922_s9, %s1730_s20 }
  0x30   : > { %p1727_p12 = pnand %p1725_p9, %p1711_p13  ;;  %p1733_p2 = scmp.lt.s32.totalorder %s1731_s22, %s1724_s18 }
  0x32   : > { %p1728_p0 = pneg %p1727_p12  ;;  %p1734_p3 = por %p1733_p2, %p1732_p11 }
  0x34   : > { %p1735_p4 = pnand %p1734_p3, %p1728_p0 }
  0x36   : > { %1738 = shalt.err (!%p1735_p4)
}
  0x37   : > { %s1808_s23 = smov 64   ;;  %s1809_s24 = smov 4  }
  0x38   : > { %1573 = dma.hbm_to_vmem [thread:$0]  (!%p1933_p10), %s1927_s11, 4096, %s1922_s9, %s1938_s13, %s1808_s23, %s1808_s23, %s1809_s24  }
  0x39   : > { %p344_p13 = scmp.lt.s32.totalorder %s1805_s8, 5  ;;  %p2156_p1 = scmp.ge.s32.totalorder %s1805_s8, 1 }
  0x3b   : > { %p345_p5 = pnand %p2156_p1, %p344_p13 }
  0x3c   : > { %s350_s16 = sand.u32 (!%p345_p5), 1, %s1781_s25  }
  0x3d   : > { %348 = sbr.rel (%p345_p5) target bundleno = 536 (0x218), region = 48  ;;  %s1398_s2 = sshll.u32 (!%p345_p5), %s350_s16, 8 }
  0x3e   : > { %s351_s7 = scalar_lea.sflag (!%p345_p5), [#allocation4], %s350_s16  ;;  %s1970_s10 = scalar_lea.vmem (!%p345_p5), [#allocation3], %s1398_s2 }
  0x44   : > { %1772 = dma.done.wait (%p1909_p7), %s351_s7, 4096  }
  0x45   : > { %1774 = vsyncadd (%p1909_p7), %s351_s7, 4294963200  ;;  %s1399_s11 = sshll.u32 %s1789_s27, 2  ;;  %p421_p10 = scmp.lt.s32.totalorder %s1793_s28, 1 }
  0x46   : > { %p423_p11 = scmp.lt.s32.totalorder %s1399_s11, 7  ;;  %s1405_s9 = sshll.u32 %s1789_s27, 6 }
  0x47   : > { %s2176_s28 = smov (!%p421_p10, %s1793_s28), 1  ;;  %p443_p6 = scmp.lt.s32.totalorder %s1405_s9, 127 }
  0x48   : > { %s2178_s11 = smov (!%p423_p11, %s1399_s11), 7  ;;  %s1400_s12 = sshll.u32 %s2176_s28, 3 }
  0x49   : > { %s426_s15 = sadd.s32 %s1400_s12, %s2178_s11  ;;  %s1406_s13 = sshll.u32 %s2176_s28, 7 }
  0x4a   : > { %s1401_s14 = sshll.u32 %s426_s15, 1  ;;  %s2157_s0 = sld [smem:[#allocation10_spill]] }
  0x4b   : > { %s2158_s1 = sld [smem:[#allocation11_spill]]  ;;  %s2180_s9 = smov (!%p443_p6, %s1405_s9), 127 }
  0x4c   : > { %s456_s11 = scalar_lea.vmem %s2136_s5, %s2176_s28  ;;  %s459_s17 = scalar_lea.vmem %s2137_s6, %s2176_s28 }
  0x4d   : > { %s446_s18 = sadd.s32 %s1406_s13, %s2180_s9  ;;  %s1408_s19 = sshll.u32 %s2176_s28, 2 }
  0x4e   : > { %s1407_s30 = sshll.u32 %s446_s18, 2  ;;  %s2160_s16 = sld [smem:[#allocation12_spill]] }
  0x4f   : > { %p1409_p7 = scmp.ne.s32.totalorder %s1789_s27, 0 }
  0x50   : > { %s1991_s23 = scalar_lea.vmem %s2157_s0, %s1401_s14  ;;  %s2159_s0 = sld [smem:[#allocation14_spill]]  ;;  %v1810_v0 = vmov (!%p1409_p7), 0.0  }
  0x51   : > { %s1996_s2 = scalar_lea.vmem %s2158_s1, %s1401_s14  ;;  %468 = sbr.rel (%p1409_p7) target bundleno = 88 (0x58), region = 56  ;;  %469 = vst [vmem:[#allocation2] sm:$0xf] (!%p1409_p7), %v1810_v0 }
  0x54   : > { %s2015_s1 = scalar_lea.vmem %s2160_s16, %s1407_s30 }
  0x56   : > { %s2010_s29 = scalar_lea.vmem %s2159_s0, %s1408_s19 }
  0x58 PF: > { %v1643_v1 = vld [vmem:[%s1970_s10 + $0x40] sm:$0xff]   ;;  %v1647_v5 = vld [vmem:[%s1970_s10 + $0x48] sm:$0xff]   ;;  %v1651_v9 = vld [vmem:[%s1970_s10 + $0x50] sm:$0xff]   ;;  %v606_v29 = vlaneseq  ;;  %v1811_v37 = vmov 1983009808   ;;  %p1474_p8 = scmp.ne.s32.totalorder %s1789_s27, 1 }
  0x59   : > { %v1644_v2 = vld [vmem:[%s1970_s10 + $0xc0] sm:$0xff]   ;;  %1480 = vmatprep.subr.bf16.mxu0 %v1643_v1  ;;  %v1648_v6 = vld [vmem:[%s1970_s10 + $0xc8] sm:$0xff]   ;;  %v1652_v10 = vld [vmem:[%s1970_s10 + $0xd0] sm:$0xff]   ;;  %v604_v38 = vunpack.c.l.s4 %v1811_v37  ;;  %s2161_s3 = scalar_lea.vmem (!%p1474_p8), %s2135_s4, %s2176_s28  ;;  %vm1215_vm1 = vcmask (!%p1474_p8), 1043456   ;;  %vm1227_vm2 = vcmask (!%p1474_p8), 3072  }
  0x5a   : > { %v1645_v3 = vld [vmem:[%s1970_s10] sm:$0xff]   ;;  %1502 = vmatprep.subr.bf16.mxu1 %v1644_v2  ;;  %v1649_v7 = vld [vmem:[%s1970_s10 + $0x8] sm:$0xff]   ;;  %v1653_v11 = vld [vmem:[%s1970_s10 + $0x10] sm:$0xff]   ;;  %v607_v34 = vshrl.u32 %v606_v29, 7 }
  0x5b   : > { %v1646_v4 = vld [vmem:[%s1970_s10 + $0x80] sm:$0xff]   ;;  %1481 = vmatpush3.bf16.msra.mxu0 %v1645_v3  ;;  %v1650_v8 = vld [vmem:[%s1970_s10 + $0x88] sm:$0xff]   ;;  %v1654_v12 = vld [vmem:[%s1970_s10 + $0x90] sm:$0xff]   ;;  %v605_v40 = vunpack.c.0.s8 %v604_v38 }
  0x5c   : > { %1503 = vmatpush3.bf16.msra.mxu1 %v1646_v4  ;;  %1482 = vmatprep.subr.bf16.mxu0 %v1647_v5  ;;  %v1655_v13 = vld [vmem:[%s1970_s10 + $0x58] sm:$0xff]   ;;  %v1659_v17 = vld [vmem:[%s1970_s10 + $0x60] sm:$0xff]   ;;  %v1663_v21 = vld [vmem:[%s1970_s10 + $0x68] sm:$0xff]  }
  0x5d   : > { %1504 = vmatprep.subr.bf16.mxu1 %v1648_v6  ;;  %v1656_v14 = vld [vmem:[%s1970_s10 + $0xd8] sm:$0xff]   ;;  %v1660_v18 = vld [vmem:[%s1970_s10 + $0xe0] sm:$0xff]   ;;  %v1664_v22 = vld [vmem:[%s1970_s10 + $0xe8] sm:$0xff]   ;;  %v2053_v42 = vsub.s32 %v605_v40, %v607_v34 }
  0x5e   : > { %v1657_v15 = vld [vmem:[%s1970_s10 + $0x18] sm:$0xff]   ;;  %v1661_v19 = vld [vmem:[%s1970_s10 + $0x20] sm:$0xff]   ;;  %v1665_v23 = vld [vmem:[%s1970_s10 + $0x28] sm:$0xff]  }
  0x5f   : > { %1483 = vmatpush3.bf16.msra.mxu0 %v1649_v7  ;;  %v1658_v16 = vld [vmem:[%s1970_s10 + $0x98] sm:$0xff]   ;;  %v1662_v20 = vld [vmem:[%s1970_s10 + $0xa0] sm:$0xff]   ;;  %v1666_v24 = vld [vmem:[%s1970_s10 + $0xa8] sm:$0xff]  }
  0x60   : > { %1505 = vmatpush3.bf16.msra.mxu1 %v1650_v8  ;;  %1484 = vmatprep.subr.bf16.mxu0 %v1651_v9  ;;  %v1667_v25 = vld [vmem:[%s1970_s10 + $0x70] sm:$0xff]   ;;  %v1671_v30 = vld [vmem:[%s1970_s10 + $0x78] sm:$0xff]   ;;  %v1680_v49 = vld [vmem:[%s2015_s1 + $0x48] sm:$0xff]  }
  0x61   : > { %1506 = vmatprep.subr.bf16.mxu1 %v1652_v10  ;;  %v1668_v26 = vld [vmem:[%s1970_s10 + $0xf0] sm:$0xff]   ;;  %v1672_v31 = vld [vmem:[%s1970_s10 + $0xf8] sm:$0xff]   ;;  %v1681_v50 = vld [vmem:[%s2015_s1 + $0xc8] sm:$0xff]  }
  0x62   : > { %v1669_v27 = vld [vmem:[%s1970_s10 + $0x30] sm:$0xff]   ;;  %v1673_v32 = vld [vmem:[%s1970_s10 + $0x38] sm:$0xff]   ;;  %v1682_v51 = vld [vmem:[%s2015_s1 + $0x8] sm:$0xff]  }
  0x63   : > { %1485 = vmatpush3.bf16.msra.mxu0 %v1653_v11  ;;  %v1670_v28 = vld [vmem:[%s1970_s10 + $0xb0] sm:$0xff]   ;;  %v1674_v33 = vld [vmem:[%s1970_s10 + $0xb8] sm:$0xff]   ;;  %v1683_v52 = vld [vmem:[%s2015_s1 + $0x88] sm:$0xff]  }
  0x64   : > { %1507 = vmatpush3.bf16.msra.mxu1 %v1654_v12  ;;  %1486 = vmatprep.subr.bf16.mxu0 %v1655_v13  ;;  %v536_v35 = vld [vmem:[%s1996_s2] sm:$0xff]  ;;  %v1684_v53 = vld [vmem:[%s2015_s1 + $0x50] sm:$0xff]   ;;  %v1688_v57 = vld [vmem:[%s2015_s1 + $0x58] sm:$0xff]  }
  0x65   : > { %1508 = vmatprep.subr.bf16.mxu1 %v1656_v14  ;;  %v1676_v36 = vld [vmem:[%s2015_s1 + $0x40] sm:$0xff]   ;;  %v602_v41 = vcombine.high %v536_v35, %v536_v35  ;;  %v609_v43 = vrot.slane %v536_v35, %v2053_v42  ;;  %v1685_v54 = vld [vmem:[%s2015_s1 + $0xd0] sm:$0xff]   ;;  %v1689_v58 = vld [vmem:[%s2015_s1 + $0xd8] sm:$0xff]  }
  0x66   : > { %v1677_v39 = vld [vmem:[%s2015_s1 + $0xc0] sm:$0xff]   ;;  %v1686_v55 = vld [vmem:[%s2015_s1 + $0x10] sm:$0xff]   ;;  %v1690_v59 = vld [vmem:[%s2015_s1 + $0x18] sm:$0xff]  }
  0x67   : > { %1487 = vmatpush3.bf16.msra.mxu0 %v1657_v15  ;;  %v616_v44 = vrot.slane %v602_v41, %v2053_v42  ;;  %v1678_v45 = vld [vmem:[%s2015_s1] sm:$0xff]   ;;  %v617_v47 = vcombine.high %v609_v43, %v609_v43  ;;  %v1687_v56 = vld [vmem:[%s2015_s1 + $0x90] sm:$0xff]   ;;  %v1691_v60 = vld [vmem:[%s2015_s1 + $0x98] sm:$0xff]  }
  0x68   : > { %1509 = vmatpush3.bf16.msra.mxu1 %v1658_v16  ;;  %1488 = vmatprep.subr.bf16.mxu0 %v1659_v17  ;;  %v1679_v46 = vld [vmem:[%s2015_s1 + $0x80] sm:$0xff]   ;;  %v1696_v1 = vld [vmem:[%s2015_s1 + $0x68] sm:$0xff]   ;;  %v1700_v5 = vld [vmem:[%s2015_s1 + $0x70] sm:$0xff]  }
  0x69   : > { %1510 = vmatprep.subr.bf16.mxu1 %v1660_v18  ;;  %v618_v48 = vcombine.high %v616_v44, %v616_v44  ;;  %847 = vmatprep.mubr.bf16.mxu0 %v617_v47  ;;  %v1692_v61 = vld [vmem:[%s2015_s1 + $0x60] sm:$0xff]   ;;  %v1697_v2 = vld [vmem:[%s2015_s1 + $0xe8] sm:$0xff]   ;;  %v1701_v6 = vld [vmem:[%s2015_s1 + $0xf0] sm:$0xff]  }
  0x6a   : > { %v1693_v62 = vld [vmem:[%s2015_s1 + $0xe0] sm:$0xff]   ;;  %v1698_v3 = vld [vmem:[%s2015_s1 + $0x28] sm:$0xff]   ;;  %v1702_v8 = vld [vmem:[%s2015_s1 + $0x30] sm:$0xff]  }
  0x6b   : > { %1489 = vmatpush3.bf16.msra.mxu0 %v1661_v19  ;;  %887 = vmatprep.mubr.bf16.mxu1 %v618_v48  ;;  %v1694_v63 = vld [vmem:[%s2015_s1 + $0x20] sm:$0xff]   ;;  %v1699_v4 = vld [vmem:[%s2015_s1 + $0xa8] sm:$0xff]   ;;  %v1703_v9 = vld [vmem:[%s2015_s1 + $0xb0] sm:$0xff]  }
  0x6c   : > { %1511 = vmatpush3.bf16.msra.mxu1 %v1662_v20  ;;  %1490 = vmatprep.subr.bf16.mxu0 %v1663_v21  ;;  %v1695_v0 = vld [vmem:[%s2015_s1 + $0xa0] sm:$0xff]   ;;  %v1704_v12 = vld [vmem:[%s2015_s1 + $0x78] sm:$0xff]  }
  0x6d   : > { %1512 = vmatprep.subr.bf16.mxu1 %v1664_v22  ;;  %v471_v7 = vld [vmem:[%s1991_s23] sm:$0xff]  ;;  %v1705_v13 = vld [vmem:[%s2015_s1 + $0xf8] sm:$0xff]  }
  0x6e   : > { %v903_v10 = vrot.slane %v471_v7, %v2053_v42  ;;  %v896_v11 = vcombine.high %v471_v7, %v471_v7  ;;  %v1706_v16 = vld [vmem:[%s2015_s1 + $0x38] sm:$0xff]   ;;  %v470_v41 = vld [vmem:[#allocation2] sm:$0xf] }
  0x6f   : > { %1491 = vmatpush3.bf16.msra.mxu0 %v1665_v23  ;;  %v1707_v17 = vld [vmem:[%s2015_s1 + $0xb8] sm:$0xff]   ;;  %v1476_v48 = vld [vmem:[%s456_s11] ss:$0 sm:$0xff] (!%p1474_p8) }
  0x70   : > { %1513 = vmatpush3.bf16.msra.mxu1 %v1666_v24  ;;  %1492 = vmatprep.subr.bf16.mxu0 %v1667_v25  ;;  %v911_v14 = vcombine.high %v903_v10, %v903_v10  ;;  %v910_v15 = vrot.slane %v896_v11, %v2053_v42 }
  0x71   : > { %1514 = vmatprep.subr.bf16.mxu1 %v1668_v26 }
  0x72   : > { %v912_v18 = vcombine.high %v910_v15, %v910_v15 }
  0x73   : > { %1493 = vmatpush3.bf16.msra.mxu0 %v1669_v27 }
  0x74   : > { %1515 = vmatpush3.bf16.msra.mxu1 %v1670_v28  ;;  %1494 = vmatprep.subr.bf16.mxu0 %v1671_v30 }
  0x75   : > { %1516 = vmatprep.subr.bf16.mxu1 %v1672_v31 }
  0x77   : > { %1495 = vmatpush3.bf16.msra.mxu0 %v1673_v32 }
  0x78   : > { %1517 = vmatpush3.bf16.msra.mxu1 %v1674_v33  ;;  %1524 = vmatprep.subr.bf16.mxu0 %v1676_v36 }
  0x79   : > { %1546 = vmatprep.subr.bf16.mxu1 %v1677_v39 }
  0x7a   : > { %848 = vmatmul.mubr.bf16.vlgmr.msra.gmra.mrb[0].mxu0 %v609_v43 }
  0x7b   : > { %888 = vmatmul.mubr.bf16.vlgmr.msra.gmra.mrb[0].mxu1 %v616_v44  ;;  %1525 = vmatpush3.bf16.msra.mxu0 %v1678_v45  ;;  %v1475_v45 = vld [vmem:[%s2161_s3] ss:$0 sm:$0xff] (!%p1474_p8) }
  0x7c   : > { %1547 = vmatpush3.bf16.msra.mxu1 %v1679_v46  ;;  %1526 = vmatprep.subr.bf16.mxu0 %v1680_v49 }
  0x7d   : > { %1548 = vmatprep.subr.bf16.mxu1 %v1681_v50  ;;  %1141 = vmatprep.mubr.bf16.mxu0 %v911_v14 }
  0x7e   : > { %1181 = vmatprep.mubr.bf16.mxu1 %v912_v18 }
  0x7f   : > { %1527 = vmatpush3.bf16.msra.mxu0 %v1682_v51 }
  0x80   : > { %1549 = vmatpush3.bf16.msra.mxu1 %v1683_v52  ;;  %1528 = vmatprep.subr.bf16.mxu0 %v1684_v53  ;;  %v1477_v52 = vld [vmem:[%s459_s17] ss:$0 sm:$0xff] (!%p1474_p8) }
  0x81   : > { %1550 = vmatprep.subr.bf16.mxu1 %v1685_v54 }
  0x83   : > { %1529 = vmatpush3.bf16.msra.mxu0 %v1686_v55 }
  0x84   : > { %1551 = vmatpush3.bf16.msra.mxu1 %v1687_v56  ;;  %1530 = vmatprep.subr.bf16.mxu0 %v1688_v57 }
  0x85   : > { %1552 = vmatprep.subr.bf16.mxu1 %v1689_v58 }
  0x87   : > { %1531 = vmatpush3.bf16.msra.mxu0 %v1690_v59 }
  0x88   : > { %1553 = vmatpush3.bf16.msra.mxu1 %v1691_v60  ;;  %1532 = vmatprep.subr.bf16.mxu0 %v1692_v61 }
  0x89   : > { %1554 = vmatprep.subr.bf16.mxu1 %v1693_v62 }
  0x8b   : > { %1533 = vmatpush3.bf16.msra.mxu0 %v1694_v63 }
  0x8c   : > { %1555 = vmatpush3.bf16.msra.mxu1 %v1695_v0  ;;  %1534 = vmatprep.subr.bf16.mxu0 %v1696_v1 }
  0x8d   : > { %1556 = vmatprep.subr.bf16.mxu1 %v1697_v2 }
  0x8f   : > { %1535 = vmatpush3.bf16.msra.mxu0 %v1698_v3 }
  0x90   : > { %1557 = vmatpush3.bf16.msra.mxu1 %v1699_v4  ;;  %1536 = vmatprep.subr.bf16.mxu0 %v1700_v5 }
  0x91   : > { %1558 = vmatprep.subr.bf16.mxu1 %v1701_v6 }
  0x93   : > { %1537 = vmatpush3.bf16.msra.mxu0 %v1702_v8 }
  0x94   : > { %1559 = vmatpush3.bf16.msra.mxu1 %v1703_v9  ;;  %1538 = vmatprep.subr.bf16.mxu0 %v1704_v12 }
  0x95   : > { %1560 = vmatprep.subr.bf16.mxu1 %v1705_v13 }
  0x97   : > { %1539 = vmatpush3.bf16.msra.mxu0 %v1706_v16 }
  0x98   : > { %1561 = vmatpush3.bf16.msra.mxu1 %v1707_v17 }
  0x9a   : > { %1142 = vmatmul.mubr.bf16.vlgmr.msra.gmra.mrb[4].mxu0 %v903_v10 }
  0x9b   : > { %1182 = vmatmul.mubr.bf16.vlgmr.msra.gmra.mrb[4].mxu1 %v910_v15 }
 0x14d   : > { %v1496_v19 = vpop.f32.mrb[0].mxu0 }
 0x14e   : > { %v1518_v20 = vpop.f32.mrb[0].mxu1  ;;  %v1497_v21 = vpop.f32.mrb[1].mxu0 }
 0x14f   : > { %v1519_v22 = vpop.f32.mrb[1].mxu1  ;;  %v1498_v23 = vadd.f32 %v1497_v21, %v1496_v19  ;;  %v1499_v25 = vpop.f32.mrb[2].mxu0 }
 0x150   : > { %v1520_v24 = vadd.f32 %v1519_v22, %v1518_v20  ;;  %v1521_v26 = vpop.f32.mrb[2].mxu1  ;;  %v1500_v27 = vpop.f32.mrb[3].mxu0 }
 0x151   : > { %v1522_v28 = vpop.f32.mrb[3].mxu1 }
 0x152   : > { %v890_v29 = vadd.f32 %v1520_v24, %v1498_v23 }
 0x16d   : > { %v1540_v30 = vpop.f32.mrb[4].mxu0 }
 0x16e   : > { %v1562_v31 = vpop.f32.mrb[4].mxu1  ;;  %v1541_v32 = vpop.f32.mrb[5].mxu0 }
 0x16f   : > { %v1563_v33 = vpop.f32.mrb[5].mxu1  ;;  %v1542_v34 = vadd.f32 %v1541_v32, %v1540_v30  ;;  %v1543_v36 = vpop.f32.mrb[6].mxu0 }
 0x170   : > { %v1564_v35 = vadd.f32 %v1563_v33, %v1562_v31  ;;  %v1565_v37 = vpop.f32.mrb[6].mxu1  ;;  %v1544_v38 = vpop.f32.mrb[7].mxu0 }
 0x171   : > { %v1566_v39 = vpop.f32.mrb[7].mxu1  ;;  %v1144_v40 = vadd.f32 %v1542_v34, %v890_v29  ;;  %1194 = sbr.rel (%p1474_p8) target bundleno = 536 (0x218), region = 60 }
 0x173   : > { %v1184_v42 = vadd.f32 %v1564_v35, %v1144_v40 }
 0x175   : > { %v1189_v43 = vadd.f32 %v1184_v42, %v470_v41 }
 0x177   : > { %1190 = vst [vmem:[#allocation2] sm:$0xf] %v1189_v43 }
 0x17e   : > { %v1195_v44 = vld [vmem:[#allocation2] sm:$0xf] }
 0x17f   : > { %v1203_v46 = vadd.f32 %v1475_v45, %v1195_v44 }
 0x181   : > { %vm1204_vm0 = vcmp.gt.f32.partialorder %v1203_v46, 0.0  ;;  %v1205_v47 = vmul.f32 0.2, %v1203_v46 }
 0x183   : > { %v1206_v49 = vsel %vm1204_vm0, %v1203_v46, %v1205_v47 }
 0x184   : > { %v1214_v50 = vmul.f32 %v1476_v48, %v1206_v49 }
 0x186   : > { %v1216_v51 = vsel %vm1215_vm1, %v1214_v50, 0.0 }
 0x187   : > { %1217 = vadd.xlane.f32.xlu0 %v1216_v51 }
 0x214   : > { %v1218_v53 = vpop.xlane.xlu0 %1217 }
 0x215   : > { %v1226_v54 = vadd.f32 %v1477_v52, %v1218_v53 }
 0x217   : > { %1228 = vst.msk [vmem:[%s2010_s29] sm:$0xf] %vm1227_vm2, %v1226_v54 }
 0x218 PF: > { %s20_s8 = sadd.s32 1, %s1805_s8   ;;  %s2162_s27 = sld [smem:[#allocation6_spill]] }
 0x219   : > { %p17_p9 = scmp.ge.s32.totalorder %s20_s8, 6   ;;  %s2163_s28 = sld [smem:[#allocation7_spill]] }
 0x21a   : > { %s2164_s29 = sld [smem:[#allocation8_spill]]  ;;  %s2165_s30 = sld [smem:[#allocation9_spill]] }
 0x21b   : > { %s2166_s24 = smov %s1781_s25  ;;  %s2167_s25 = smov %s1785_s26 }
 0x21c   : > { %s2168_s26 = smov %s1919_s21  ;;  %19 = sbr.rel (!%p17_p9) target bundleno = 11 (0xb), region = 114 }
 0x223   :  { %1248 = vsyncpa [#allocation4], 1 }
 0x224   :  { %1250 = vsyncpa [#allocation4 + $0x1], 1 }

</bundles_post_ra>
